<compile_context>
chip_gen: v5e
topology: v5e:2x2
jax: 0.10.0
libtpu: 0.0.40
codegen_flags: <defaults>
</compile_context>

<pallas_src>
import jax
import jax.numpy as jnp
from jax.experimental import pallas as pl
from jax.experimental.pallas import tpu as pltpu


# ----------------------------- Pallas kernel -------------------------------

def resblock_kernel(x_ref, w1_ref, b1_ref, w2_ref, wsc_ref, b2sc_ref,
                    o_ref, xs_ref, mid_ref):
    # x_ref    : (1, H, W*Cin)  f32   one image, lane-dense (H, W*Cin) layout
    # w1_ref   : (3, (W+2)*Cin,  W*Cout) bf16  conv1 banded weights (BN1 scale folded)
    # b1_ref   : (1, W*Cout)    f32   folded BN1 bias, tiled over W
    # w2_ref   : (3, (W+2)*Cout, W*Cout) bf16  conv2 banded weights (BN2 scale folded)
    # wsc_ref  : (W*Cin, W*Cout) bf16 block-diagonal shortcut 1x1 conv (BN scale folded)
    # b2sc_ref : (1, W*Cout)    f32   folded (BN2 bias + shortcut BN bias), tiled
    # o_ref    : (1, H, W*Cout) f32   lane-dense output (W*Cout = 128)
    # xs_ref   : VMEM (H+2, (W+2)*Cin)  f32  zero-padded input scratch
    # mid_ref  : VMEM (H+2, (W+2)*Cout) f32  zero-padded conv1 activation scratch
    H = x_ref.shape[1]
    WCin = x_ref.shape[2]                  # W * Cin
    WCout = o_ref.shape[2]                 # W * Cout
    Cin = (xs_ref.shape[1] - WCin) // 2
    Cout = (mid_ref.shape[1] - WCout) // 2
    bf16 = jnp.bfloat16
    f32 = jnp.float32

    x = x_ref[0]                           # (H, W*Cin) f32

    # ---- zero-padded input: one contiguous fill + one interior store (every step,
    # megacore-safe since each core owns its scratch) ----
    xs_ref[...] = jnp.zeros_like(xs_ref)
    xs_ref[1:H + 1, Cin:Cin + WCin] = x

    # ---- conv1 (3x3, pad=1, stride=1): 3 row-shifted lane-dense matmuls,
    # BN1 scale folded into w1, then bias + ReLU ----
    acc1 = jnp.dot(xs_ref[0:H, :].astype(bf16), w1_ref[0],
                   preferred_element_type=f32)
    acc1 = acc1 + jnp.dot(xs_ref[1:H + 1, :].astype(bf16), w1_ref[1],
                          preferred_element_type=f32)
    acc1 = acc1 + jnp.dot(xs_ref[2:H + 2, :].astype(bf16), w1_ref[2],
                          preferred_element_type=f32)
    out1 = jnp.maximum(acc1 + b1_ref[...], 0.0)        # (H, W*Cout) f32
    # TODO(synk): Dropout2d is identity in inference mode; training-time channel
    # dropout (RNG + rescale) is not implemented here.

    # ---- zero-padded conv1 activation ----
    mid_ref[...] = jnp.zeros_like(mid_ref)
    mid_ref[1:H + 1, Cout:Cout + WCout] = out1

    # ---- conv2 (3x3, pad=1) + shortcut (1x1 conv), BN scales folded,
    # single fused bias (b2 + bsc), residual add, final ReLU ----
    acc2 = jnp.dot(x.astype(bf16), wsc_ref[...], preferred_element_type=f32)
    acc2 = acc2 + jnp.dot(mid_ref[0:H, :].astype(bf16), w2_ref[0],
                          preferred_element_type=f32)
    acc2 = acc2 + jnp.dot(mid_ref[1:H + 1, :].astype(bf16), w2_ref[1],
                          preferred_element_type=f32)
    acc2 = acc2 + jnp.dot(mid_ref[2:H + 2, :].astype(bf16), w2_ref[2],
                          preferred_element_type=f32)
    o_ref[0] = jnp.maximum(acc2 + b2sc_ref[...], 0.0)   # lane-dense (H, 128) store


# ------------------------------ wrapper ------------------------------------

def _banded_conv_weight(w_scaled, Wdim):
    # w_scaled: (3, 3, Ci, Co) f32 with the BN scale already folded in.
    # Returns (3, (Wdim+2)*Ci, Wdim*Co): for each row tap di, a banded matrix M with
    # M[(j+dj)*Ci + c, j*Co + o] = w_scaled[di, dj, c, o]  (the (H, W*C) layout conv).
    _, _, Ci, Co = w_scaled.shape
    eye = jnp.eye(Wdim, dtype=jnp.float32)
    mats = []
    for di in range(3):
        m = jnp.zeros(((Wdim + 2) * Ci, Wdim * Co), jnp.float32)
        for dj in range(3):
            blk = jnp.einsum('jk,co->jcko', eye, w_scaled[di, dj])
            blk = blk.reshape(Wdim * Ci, Wdim * Co)
            m = m.at[dj * Ci:dj * Ci + Wdim * Ci, :].add(blk)
        mats.append(m)
    return jnp.stack(mats, axis=0)


@jax.jit
def residual_block(x_nhwc, w1, s1, b1, w2, s2, b2, wsc, ssc, bsc):
    N, H, W, Cin = x_nhwc.shape
    Cout = w1.shape[-1]
    f32 = jnp.float32
    bf16 = jnp.bfloat16

    # Fold BN scales into conv / shortcut weights (free at load time); build the
    # banded (H, W*C)-layout weight matrices; cast MXU operands to bf16.
    w1f = _banded_conv_weight((w1 * s1[0]).reshape(3, 3, Cin, Cout), W).astype(bf16)
    w2f = _banded_conv_weight((w2 * s2[0]).reshape(3, 3, Cout, Cout), W).astype(bf16)
    eye = jnp.eye(W, dtype=f32)
    wscf = jnp.einsum('jk,co->jcko', eye, wsc * ssc).reshape(W * Cin, W * Cout).astype(bf16)
    b1f = jnp.tile(b1.astype(f32), (1, W))              # (1, W*Cout)
    b2scf = jnp.tile((b2 + bsc).astype(f32), (1, W))    # fused conv2 + shortcut bias

    # Lane-dense activation layout: NHWC -> (N, H, W*Cin) is a free row-major reshape.
    x_flat = x_nhwc.reshape(N, H, W * Cin).astype(f32)

    out = pl.pallas_call(
        resblock_kernel,
        out_shape=jax.ShapeDtypeStruct((N, H, W * Cout), f32),
        grid=(N,),
        in_specs=[
            pl.BlockSpec((1, H, W * Cin), lambda n: (n, 0, 0)),
            pl.BlockSpec((3, (W + 2) * Cin, W * Cout), lambda n: (0, 0, 0)),
            pl.BlockSpec((1, W * Cout), lambda n: (0, 0)),
            pl.BlockSpec((3, (W + 2) * Cout, W * Cout), lambda n: (0, 0, 0)),
            pl.BlockSpec((W * Cin, W * Cout), lambda n: (0, 0)),
            pl.BlockSpec((1, W * Cout), lambda n: (0, 0)),
        ],
        out_specs=pl.BlockSpec((1, H, W * Cout), lambda n: (n, 0, 0)),
        scratch_shapes=[
            pltpu.VMEM((H + 2, (W + 2) * Cin), f32),     # zero-padded input
            pltpu.VMEM((H + 2, (W + 2) * Cout), f32),    # zero-padded conv1 activation
        ],
        compiler_params=pltpu.CompilerParams(
            dimension_semantics=("parallel",)),
    )(x_flat, w1f, b1f, w2f, wscf, b2scf)
    return out.reshape(N, H, W, Cout)


# -------------------------- pure-JAX reference ------------------------------

def conv3x3_ref(x, w):  # x: NHWC, w: (3,3,Cin,Cout), pad=1 stride=1
    N, H, W, _ = x.shape
    xp = jnp.pad(x, ((0, 0), (1, 1), (1, 1), (0, 0)))
    out = 0.0
    for di in range(3):
        for dj in range(3):
            out = out + jnp.einsum('nhwc,cd->nhwd',
                                   xp[:, di:di + H, dj:dj + W, :], w[di, dj])
    return out


def residual_block_ref(x, w1, s1, b1, w2, s2, b2, wsc, ssc, bsc):
    o = jnp.maximum(conv3x3_ref(x, w1.reshape(3, 3, *w1.shape[1:])) * s1 + b1, 0.0)
    o = conv3x3_ref(o, w2.reshape(3, 3, *w2.shape[1:])) * s2 + b2
    sc = jnp.einsum('nhwc,cd->nhwd', x, wsc) * ssc + bsc
    return jnp.maximum(o + sc, 0.0)


# ------------------------------- main ---------------------------------------

if __name__ == "__main__":
    key = jax.random.PRNGKey(0)
    keys = jax.random.split(key, 12)

    # Module hyper-params (stride=1, in_channels != out_channels -> shortcut active)
    N, Cin, Cout, H, W = 2, 4, 8, 16, 16
    eps = 1e-5

    # Input (PyTorch would be NCHW; the kernel works in NHWC / (N, H, W*C))
    x_nchw = jax.random.normal(keys[0], (N, Cin, H, W), jnp.float32)
    x_nhwc = jnp.transpose(x_nchw, (0, 2, 3, 1))

    # conv1: torch weight (Cout, Cin, 3, 3) -> (3,3,Cin,Cout) -> (9, Cin, Cout)
    w1_t = 0.2 * jax.random.normal(keys[1], (Cout, Cin, 3, 3), jnp.float32)
    w1 = jnp.transpose(w1_t, (2, 3, 1, 0)).reshape(9, Cin, Cout)
    # conv2: (Cout, Cout, 3, 3)
    w2_t = 0.2 * jax.random.normal(keys[2], (Cout, Cout, 3, 3), jnp.float32)
    w2 = jnp.transpose(w2_t, (2, 3, 1, 0)).reshape(9, Cout, Cout)
    # shortcut 1x1 conv: (Cout, Cin, 1, 1) -> (Cin, Cout)
    wsc_t = 0.2 * jax.random.normal(keys[3], (Cout, Cin, 1, 1), jnp.float32)
    wsc = jnp.transpose(wsc_t[:, :, 0, 0], (1, 0))

    # BatchNorm params (inference mode, folded into scale/bias)
    def bn_fold(kg, kb, km, kv, C):
        gamma = 1.0 + 0.1 * jax.random.normal(kg, (C,), jnp.float32)
        beta = 0.1 * jax.random.normal(kb, (C,), jnp.float32)
        mean = 0.1 * jax.random.normal(km, (C,), jnp.float32)
        var = jnp.abs(1.0 + 0.1 * jax.random.normal(kv, (C,), jnp.float32))
        scale = gamma / jnp.sqrt(var + eps)
        bias = beta - mean * scale
        return scale.reshape(1, C), bias.reshape(1, C)

    s1, b1 = bn_fold(keys[4], keys[5], keys[6], keys[7], Cout)
    s2, b2 = bn_fold(keys[8], keys[9], keys[10], keys[11], Cout)
    kk = jax.random.split(keys[11], 4)
    ssc, bsc = bn_fold(kk[0], kk[1], kk[2], kk[3], Cout)

    out = residual_block(x_nhwc, w1, s1, b1, w2, s2, b2, wsc, ssc, bsc)
    out = jax.block_until_ready(out)

    ref = residual_block_ref(x_nhwc, w1, s1, b1, w2, s2, b2, wsc, ssc, bsc)
    assert out.shape == (N, H, W, Cout)
    # bf16 MXU operands (f32 accumulation) -> compare against the f32 reference with a
    # bf16-appropriate tolerance.
    assert jnp.allclose(out, ref, rtol=5e-2, atol=5e-2), "mismatch vs JAX reference"

    print("KERNEL_OK")
</pallas_src>

<mosaic_0001>
module attributes {stable_mosaic.version = 11 : i64} {
  func.func @resblock_kernel(%arg0: i32, %arg1: memref<1x16x64xf32, #tpu.memory_space<vmem>>, %arg2: memref<3x72x128xbf16, #tpu.memory_space<vmem>>, %arg3: memref<1x128xf32, #tpu.memory_space<vmem>>, %arg4: memref<3x144x128xbf16, #tpu.memory_space<vmem>>, %arg5: memref<64x128xbf16, #tpu.memory_space<vmem>>, %arg6: memref<1x128xf32, #tpu.memory_space<vmem>>, %arg7: memref<1x16x128xf32, #tpu.memory_space<vmem>>, %arg8: memref<18x72xf32, #tpu.memory_space<vmem>>, %arg9: memref<18x144xf32, #tpu.memory_space<vmem>>) attributes {dimension_semantics = [#tpu.dimension_semantics<parallel>], iteration_bounds = array<i64: 2>, scalar_prefetch = 0 : i64, scratch_operands = 2 : i64, tpu.core_type = #tpu.core_type<tc>, window_params = [{transform_indices = @transform_0, window_bounds = array<i64: 1, 16, 64>}, {pipeline_mode = #tpu.pipeline_mode<synchronous>, transform_indices = @transform_1, window_bounds = array<i64: 3, 72, 128>}, {pipeline_mode = #tpu.pipeline_mode<synchronous>, transform_indices = @transform_2, window_bounds = array<i64: 1, 128>}, {pipeline_mode = #tpu.pipeline_mode<synchronous>, transform_indices = @transform_3, window_bounds = array<i64: 3, 144, 128>}, {pipeline_mode = #tpu.pipeline_mode<synchronous>, transform_indices = @transform_4, window_bounds = array<i64: 64, 128>}, {pipeline_mode = #tpu.pipeline_mode<synchronous>, transform_indices = @transform_5, window_bounds = array<i64: 1, 128>}, {transform_indices = @transform_6, window_bounds = array<i64: 1, 16, 128>}]} {
    %c0 = arith.constant 0 : index
    %c0_0 = arith.constant 0 : index
    %c0_1 = arith.constant 0 : index
    %0 = vector.load %arg1[%c0, %c0_0, %c0_1] : memref<1x16x64xf32, #tpu.memory_space<vmem>>, vector<1x16x64xf32>
    %1 = vector.shape_cast %0 : vector<1x16x64xf32> to vector<16x64xf32>
    %cst = arith.constant 0.000000e+00 : f32
    %2 = vector.broadcast %cst : f32 to vector<18x72xf32>
    %c0_2 = arith.constant 0 : index
    %c0_3 = arith.constant 0 : index
    %3 = vector.load %arg8[%c0_2, %c0_3] : memref<18x72xf32, #tpu.memory_space<vmem>>, vector<18x72xf32>
    tpu.vector_store %arg8[%c0_2, %c0_3], %2 {strides = array<i32>} : memref<18x72xf32, #tpu.memory_space<vmem>>, vector<18x72xf32>,
    %c1 = arith.constant 1 : index
    %c4 = arith.constant 4 : index
    %4 = vector.load %arg8[%c1, %c4] : memref<18x72xf32, #tpu.memory_space<vmem>>, vector<16x64xf32>
    tpu.vector_store %arg8[%c1, %c4], %1 {strides = array<i32>} : memref<18x72xf32, #tpu.memory_space<vmem>>, vector<16x64xf32>,
    %c0_4 = arith.constant 0 : index
    %c0_5 = arith.constant 0 : index
    %5 = vector.load %arg8[%c0_4, %c0_5] : memref<18x72xf32, #tpu.memory_space<vmem>>, vector<16x72xf32>
    %6 = arith.truncf %5 : vector<16x72xf32> to vector<16x72xbf16>
    %c0_6 = arith.constant 0 : index
    %c0_7 = arith.constant 0 : index
    %c0_8 = arith.constant 0 : index
    %7 = vector.load %arg2[%c0_6, %c0_7, %c0_8] : memref<3x72x128xbf16, #tpu.memory_space<vmem>>, vector<1x72x128xbf16>
    %8 = vector.shape_cast %7 : vector<1x72x128xbf16> to vector<72x128xbf16>
    %cst_9 = arith.constant dense<0.000000e+00> : vector<16x128xf32>
    %9 = tpu.matmul %6, %8, %cst_9 {dimension_numbers = #tpu.dot_dimension_numbers<[1], [0], [0], [1], [0, 0, 1, 1], [], []>} : vector<16x72xbf16>, vector<72x128xbf16>, vector<16x128xf32> -> vector<16x128xf32>
    %c1_10 = arith.constant 1 : index
    %c0_11 = arith.constant 0 : index
    %10 = vector.load %arg8[%c1_10, %c0_11] : memref<18x72xf32, #tpu.memory_space<vmem>>, vector<16x72xf32>
    %11 = arith.truncf %10 : vector<16x72xf32> to vector<16x72xbf16>
    %c1_12 = arith.constant 1 : index
    %c0_13 = arith.constant 0 : index
    %c0_14 = arith.constant 0 : index
    %12 = vector.load %arg2[%c1_12, %c0_13, %c0_14] : memref<3x72x128xbf16, #tpu.memory_space<vmem>>, vector<1x72x128xbf16>
    %13 = vector.shape_cast %12 : vector<1x72x128xbf16> to vector<72x128xbf16>
    %cst_15 = arith.constant dense<0.000000e+00> : vector<16x128xf32>
    %14 = tpu.matmul %11, %13, %cst_15 {dimension_numbers = #tpu.dot_dimension_numbers<[1], [0], [0], [1], [0, 0, 1, 1], [], []>} : vector<16x72xbf16>, vector<72x128xbf16>, vector<16x128xf32> -> vector<16x128xf32>
    %15 = arith.addf %9, %14 : vector<16x128xf32>
    %c2 = arith.constant 2 : index
    %c0_16 = arith.constant 0 : index
    %16 = vector.load %arg8[%c2, %c0_16] : memref<18x72xf32, #tpu.memory_space<vmem>>, vector<16x72xf32>
    %17 = arith.truncf %16 : vector<16x72xf32> to vector<16x72xbf16>
    %c2_17 = arith.constant 2 : index
    %c0_18 = arith.constant 0 : index
    %c0_19 = arith.constant 0 : index
    %18 = vector.load %arg2[%c2_17, %c0_18, %c0_19] : memref<3x72x128xbf16, #tpu.memory_space<vmem>>, vector<1x72x128xbf16>
    %19 = vector.shape_cast %18 : vector<1x72x128xbf16> to vector<72x128xbf16>
    %cst_20 = arith.constant dense<0.000000e+00> : vector<16x128xf32>
    %20 = tpu.matmul %17, %19, %cst_20 {dimension_numbers = #tpu.dot_dimension_numbers<[1], [0], [0], [1], [0, 0, 1, 1], [], []>} : vector<16x72xbf16>, vector<72x128xbf16>, vector<16x128xf32> -> vector<16x128xf32>
    %21 = arith.addf %15, %20 : vector<16x128xf32>
    %c0_21 = arith.constant 0 : index
    %c0_22 = arith.constant 0 : index
    %22 = vector.load %arg3[%c0_21, %c0_22] : memref<1x128xf32, #tpu.memory_space<vmem>>, vector<1x128xf32>
    %23 = vector.broadcast %22 : vector<1x128xf32> to vector<16x128xf32>
    %24 = arith.addf %21, %23 : vector<16x128xf32>
    %cst_23 = arith.constant 0.000000e+00 : f32
    %25 = vector.broadcast %cst_23 : f32 to vector<16x128xf32>
    %26 = arith.maximumf %24, %25 : vector<16x128xf32>
    %cst_24 = arith.constant 0.000000e+00 : f32
    %27 = vector.broadcast %cst_24 : f32 to vector<18x144xf32>
    %c0_25 = arith.constant 0 : index
    %c0_26 = arith.constant 0 : index
    %28 = vector.load %arg9[%c0_25, %c0_26] : memref<18x144xf32, #tpu.memory_space<vmem>>, vector<18x144xf32>
    tpu.vector_store %arg9[%c0_25, %c0_26], %27 {strides = array<i32>} : memref<18x144xf32, #tpu.memory_space<vmem>>, vector<18x144xf32>,
    %c1_27 = arith.constant 1 : index
    %c8 = arith.constant 8 : index
    %29 = vector.load %arg9[%c1_27, %c8] : memref<18x144xf32, #tpu.memory_space<vmem>>, vector<16x128xf32>
    tpu.vector_store %arg9[%c1_27, %c8], %26 {strides = array<i32>} : memref<18x144xf32, #tpu.memory_space<vmem>>, vector<16x128xf32>,
    %30 = arith.truncf %1 : vector<16x64xf32> to vector<16x64xbf16>
    %c0_28 = arith.constant 0 : index
    %c0_29 = arith.constant 0 : index
    %31 = vector.load %arg5[%c0_28, %c0_29] : memref<64x128xbf16, #tpu.memory_space<vmem>>, vector<64x128xbf16>
    %cst_30 = arith.constant dense<0.000000e+00> : vector<16x128xf32>
    %32 = tpu.matmul %30, %31, %cst_30 {dimension_numbers = #tpu.dot_dimension_numbers<[1], [0], [0], [1], [0, 0, 1, 1], [], []>} : vector<16x64xbf16>, vector<64x128xbf16>, vector<16x128xf32> -> vector<16x128xf32>
    %c0_31 = arith.constant 0 : index
    %c0_32 = arith.constant 0 : index
    %33 = vector.load %arg9[%c0_31, %c0_32] : memref<18x144xf32, #tpu.memory_space<vmem>>, vector<16x144xf32>
    %34 = arith.truncf %33 : vector<16x144xf32> to vector<16x144xbf16>
    %c0_33 = arith.constant 0 : index
    %c0_34 = arith.constant 0 : index
    %c0_35 = arith.constant 0 : index
    %35 = vector.load %arg4[%c0_33, %c0_34, %c0_35] : memref<3x144x128xbf16, #tpu.memory_space<vmem>>, vector<1x144x128xbf16>
    %36 = vector.shape_cast %35 : vector<1x144x128xbf16> to vector<144x128xbf16>
    %cst_36 = arith.constant dense<0.000000e+00> : vector<16x128xf32>
    %37 = tpu.matmul %34, %36, %cst_36 {dimension_numbers = #tpu.dot_dimension_numbers<[1], [0], [0], [1], [0, 0, 1, 1], [], []>} : vector<16x144xbf16>, vector<144x128xbf16>, vector<16x128xf32> -> vector<16x128xf32>
    %38 = arith.addf %32, %37 : vector<16x128xf32>
    %c1_37 = arith.constant 1 : index
    %c0_38 = arith.constant 0 : index
    %39 = vector.load %arg9[%c1_37, %c0_38] : memref<18x144xf32, #tpu.memory_space<vmem>>, vector<16x144xf32>
    %40 = arith.truncf %39 : vector<16x144xf32> to vector<16x144xbf16>
    %c1_39 = arith.constant 1 : index
    %c0_40 = arith.constant 0 : index
    %c0_41 = arith.constant 0 : index
    %41 = vector.load %arg4[%c1_39, %c0_40, %c0_41] : memref<3x144x128xbf16, #tpu.memory_space<vmem>>, vector<1x144x128xbf16>
    %42 = vector.shape_cast %41 : vector<1x144x128xbf16> to vector<144x128xbf16>
    %cst_42 = arith.constant dense<0.000000e+00> : vector<16x128xf32>
    %43 = tpu.matmul %40, %42, %cst_42 {dimension_numbers = #tpu.dot_dimension_numbers<[1], [0], [0], [1], [0, 0, 1, 1], [], []>} : vector<16x144xbf16>, vector<144x128xbf16>, vector<16x128xf32> -> vector<16x128xf32>
    %44 = arith.addf %38, %43 : vector<16x128xf32>
    %c2_43 = arith.constant 2 : index
    %c0_44 = arith.constant 0 : index
    %45 = vector.load %arg9[%c2_43, %c0_44] : memref<18x144xf32, #tpu.memory_space<vmem>>, vector<16x144xf32>
    %46 = arith.truncf %45 : vector<16x144xf32> to vector<16x144xbf16>
    %c2_45 = arith.constant 2 : index
    %c0_46 = arith.constant 0 : index
    %c0_47 = arith.constant 0 : index
    %47 = vector.load %arg4[%c2_45, %c0_46, %c0_47] : memref<3x144x128xbf16, #tpu.memory_space<vmem>>, vector<1x144x128xbf16>
    %48 = vector.shape_cast %47 : vector<1x144x128xbf16> to vector<144x128xbf16>
    %cst_48 = arith.constant dense<0.000000e+00> : vector<16x128xf32>
    %49 = tpu.matmul %46, %48, %cst_48 {dimension_numbers = #tpu.dot_dimension_numbers<[1], [0], [0], [1], [0, 0, 1, 1], [], []>} : vector<16x144xbf16>, vector<144x128xbf16>, vector<16x128xf32> -> vector<16x128xf32>
    %50 = arith.addf %44, %49 : vector<16x128xf32>
    %c0_49 = arith.constant 0 : index
    %c0_50 = arith.constant 0 : index
    %51 = vector.load %arg6[%c0_49, %c0_50] : memref<1x128xf32, #tpu.memory_space<vmem>>, vector<1x128xf32>
    %52 = vector.broadcast %51 : vector<1x128xf32> to vector<16x128xf32>
    %53 = arith.addf %50, %52 : vector<16x128xf32>
    %cst_51 = arith.constant 0.000000e+00 : f32
    %54 = vector.broadcast %cst_51 : f32 to vector<16x128xf32>
    %55 = arith.maximumf %53, %54 : vector<16x128xf32>
    %c0_52 = arith.constant 0 : index
    %c0_53 = arith.constant 0 : index
    %c0_54 = arith.constant 0 : index
    %56 = vector.load %arg7[%c0_52, %c0_53, %c0_54] : memref<1x16x128xf32, #tpu.memory_space<vmem>>, vector<1x16x128xf32>
    %57 = vector.shape_cast %56 : vector<1x16x128xf32> to vector<16x128xf32>
    %58 = vector.shape_cast %55 : vector<16x128xf32> to vector<1x16x128xf32>
    tpu.vector_store %arg7[%c0_52, %c0_53, %c0_54], %58 {strides = array<i32>} : memref<1x16x128xf32, #tpu.memory_space<vmem>>, vector<1x16x128xf32>,
    return
  }
  func.func @transform_0(%arg0: i32) -> (i32, i32, i32) {
    %c0_i32 = arith.constant 0 : i32
    %c0_i32_0 = arith.constant 0 : i32
    %c0_i32_1 = arith.constant 0 : i32
    return %arg0, %c0_i32, %c0_i32_0 : i32, i32, i32
  }
  func.func @transform_1(%arg0: i32) -> (i32, i32, i32) {
    %c0_i32 = arith.constant 0 : i32
    %c0_i32_0 = arith.constant 0 : i32
    %c0_i32_1 = arith.constant 0 : i32
    %c0_i32_2 = arith.constant 0 : i32
    return %c0_i32, %c0_i32_0, %c0_i32_1 : i32, i32, i32
  }
  func.func @transform_2(%arg0: i32) -> (i32, i32) {
    %c0_i32 = arith.constant 0 : i32
    %c0_i32_0 = arith.constant 0 : i32
    %c0_i32_1 = arith.constant 0 : i32
    return %c0_i32, %c0_i32_0 : i32, i32
  }
  func.func @transform_3(%arg0: i32) -> (i32, i32, i32) {
    %c0_i32 = arith.constant 0 : i32
    %c0_i32_0 = arith.constant 0 : i32
    %c0_i32_1 = arith.constant 0 : i32
    %c0_i32_2 = arith.constant 0 : i32
    return %c0_i32, %c0_i32_0, %c0_i32_1 : i32, i32, i32
  }
  func.func @transform_4(%arg0: i32) -> (i32, i32) {
    %c0_i32 = arith.constant 0 : i32
    %c0_i32_0 = arith.constant 0 : i32
    %c0_i32_1 = arith.constant 0 : i32
    return %c0_i32, %c0_i32_0 : i32, i32
  }
  func.func @transform_5(%arg0: i32) -> (i32, i32) {
    %c0_i32 = arith.constant 0 : i32
    %c0_i32_0 = arith.constant 0 : i32
    %c0_i32_1 = arith.constant 0 : i32
    return %c0_i32, %c0_i32_0 : i32, i32
  }
  func.func @transform_6(%arg0: i32) -> (i32, i32, i32) {
    %c0_i32 = arith.constant 0 : i32
    %c0_i32_0 = arith.constant 0 : i32
    %c0_i32_1 = arith.constant 0 : i32
    return %arg0, %c0_i32, %c0_i32_0 : i32, i32, i32
  }
}

</mosaic_0001>

<bundles_post_ra>
// kernel: residual_block.1
= control target key start
LH: loop header
LB: loop body
LE: loop exit
PB: predicated region body
PF: predicated region fallthrough
CT: control target
= control target key end

     0   :  { %s1337_s21 = smov 0   ;;  %s1540_s0 = inlined_call_operand.vmem [shape: f32[2,16,64], index: 0, kind: input, shape index: {}]   ;;  %s1541_s1 = inlined_call_operand.vmem [shape: bf16[3,72,128], index: 1, kind: input, shape index: {}]   ;;  %s1542_s2 = inlined_call_operand.vmem [shape: f32[1,128], index: 2, kind: input, shape index: {}]   ;;  %s1543_s3 = inlined_call_operand.vmem [shape: bf16[3,144,128], index: 3, kind: input, shape index: {}]   ;;  %s1544_s4 = inlined_call_operand.vmem [shape: bf16[64,128], index: 4, kind: input, shape index: {}]   ;;  %s1545_s5 = inlined_call_operand.vmem [shape: f32[1,128], index: 5, kind: input, shape index: {}]   ;;  %s1546_s6 = inlined_call_operand.vmem [shape: f32[2,16,128], index: 6, kind: output, shape index: {}]  }
   0x1 LB: > { %s989_s22 = sadd.s32 4294967295, %s1297_s21   ;;  %p993_p0 = scmp.ge.s32.totalorder %s1297_s21, 1  ;;  %s1297_s21 = sphi %s1337_s21, %s16_s21  }
   0x2   : > { %p212_p1 = scmp.lt.s32.totalorder %s1297_s21, 3 }
   0x4   : > { %p213_p2 = pnand %p993_p0, %p212_p1 }
   0x5   : > { %p242_p3 = scmp.lt.s32.totalorder (!%p213_p2), %s989_s22, 1  ;;  %s1300_s9 = smov (!%p213_p2), 4  }
   0x6   : > { %216 = sbr.rel (%p213_p2) target bundleno = 608 (0x260), region = 44  ;;  %s1301_s15 = smov (!%p213_p2), 8  }
   0xb   : > { %v1006_v0 = vld [vmem:[%s1541_s1 + $0x44] sm:$0xf]  ;;  %vm255_vm0 = vcmask 588800   ;;  %vm326_vm1 = vcmask 1043456   ;;  %v282_v2 = vld [vmem:[%s1541_s1 + $0x20] sm:$0xf] }
   0xc   : > { %v313_v1 = vunpack.c.l.b16 %v1006_v0  ;;  %v1049_v3 = vld [vmem:[%s1541_s1 + $0x68] sm:$0xf]  ;;  %s1548_s22 = smov (!%p242_p3, %s989_s22), 1  ;;  %v361_v4 = vunpack.c.l.b16 %v282_v2  ;;  %v1299_v6 = vmov 0.0   ;;  %v1242_v16 = vld [vmem:[%s1541_s1 + $0x3c] sm:$0xff]  ;;  %vm258_vm2 = vcmask 582656  }
   0xd   : > { %v421_v5 = vunpack.c.l.b16 %v1049_v3  ;;  %256 = vst.msk [vmem:[#allocation2] sm:$0xff] %vm255_vm0, %v1299_v6  ;;  %s1233_s29 = sshll.u32 %s1548_s22, 4  ;;  %v1238_v17 = vld [vmem:[%s1541_s1 + $0x18] sm:$0xff]  ;;  %v1246_v18 = vld [vmem:[%s1541_s1 + $0x60] sm:$0xff]  ;;  %v1237_v20 = vld [vmem:[%s1541_s1 + $0x10] sm:$0xff]  ;;  %vm268_vm3 = vcmask 556064  }
   0xe   : > { %v318_v7 = vpack.c.b16 %v313_v1, %v313_v1  ;;  %257 = vst.msk [vmem:[#allocation2 + $0x8] sm:$0xff] %vm255_vm0, %v1299_v6  ;;  %v366_v8 = vpack.c.b16 %v361_v4, %v361_v4  ;;  %s246_s8 = scalar_lea.vmem %s1540_s0, %s1233_s29  ;;  %v1241_v19 = vld [vmem:[%s1541_s1 + $0x34] sm:$0xff]  ;;  %v1240_v22 = vld [vmem:[%s1541_s1 + $0x2c] sm:$0xff]  ;;  %v1239_v25 = vld [vmem:[%s1541_s1 + $0x24] sm:$0xff]  ;;  %vm467_vm4 = vcmask 123904   ;;  %vm471_vm5 = vcmask 1040384   ;;  %s251_s19 = scalar_lea.vmem %s1546_s6, %s1233_s29 }
   0xf   : > { %v426_v9 = vpack.c.b16 %v421_v5, %v421_v5  ;;  %461 = vst [vmem:[#allocation3] sm:$0xff] %v1299_v6  ;;  %v1369_v11 = vld [vmem:[%s246_s8] sm:$0xff]  ;;  %v1371_v12 = vld [vmem:[%s246_s8 + $0x8] sm:$0xff]  ;;  %v1245_v21 = vld [vmem:[%s1541_s1 + $0x58] sm:$0xff]  ;;  %vm462_vm6 = vcmask 130048   ;;  %vm638_vm7 = vcmask 523264  }
  0x10   : > { %v328_v10 = vsel %vm326_vm1, %v318_v7, 0  ;;  %464 = vst [vmem:[#allocation3 + $0x10] sm:$0xff] %v1299_v6  ;;  %v375_v13 = vsel %vm326_vm1, %v366_v8, 0  ;;  %262 = vrot.lane.b32.xlu0 %v1369_v11, %s1300_s9  ;;  %v496_v15 = vpack.c.bf16 %v1371_v12, %v1369_v11  ;;  %v1236_v23 = vld [vmem:[%s1541_s1 + $0x8] sm:$0xff]  ;;  %v1244_v24 = vld [vmem:[%s1541_s1 + $0x50] sm:$0xff]  ;;  %v1235_v26 = vld [vmem:[%s1541_s1] sm:$0xff] }
  0x11   : > { %333 = vmatpush.bf16.msra.mxu0 %v328_v10  ;;  %v435_v14 = vsel %vm326_vm1, %v426_v9, 0  ;;  %466 = vst [vmem:[#allocation3 + $0x20] sm:$0x3] %v1299_v6  ;;  %380 = vmatpush.bf16.msra.mxu1 %v375_v13  ;;  %v1243_v27 = vld [vmem:[%s1541_s1 + $0x48] sm:$0xff]  ;;  %v1289_v42 = vld [vmem:[%s1542_s2] ss:$0 sm:$0xff] }
  0x12   : > { %440 = vmatpush.bf16.msra.mxu2 %v435_v14  ;;  %259 = vst.msk [vmem:[#allocation2 + $0x10] sm:$0x3] %vm258_vm2, %v1299_v6  ;;  %v1258_v57 = vld [vmem:[%s1543_s3 + $0x38] sm:$0xff]  ;;  %v1276_v59 = vld [vmem:[%s1543_s3 + $0xc8] sm:$0xff]  ;;  %v1267_v60 = vld [vmem:[%s1543_s3 + $0x80] sm:$0xff]  ;;  %vm492_vm8 = vcmask 1040448  }
  0x13   : > { %468 = vst.msk [vmem:[#allocation3 + $0x28] sm:$0x3] %vm467_vm4, %v1299_v6  ;;  %v1250_v58 = vld [vmem:[%s1544_s4 + $0x18] sm:$0xff]  ;;  %586 = vmatpush.bf16.msra.mxu3 %v1258_v57  ;;  %v1257_v61 = vld [vmem:[%s1543_s3 + $0x30] sm:$0xff]  ;;  %v1275_v63 = vld [vmem:[%s1543_s3 + $0xc0] sm:$0xff]  ;;  %vm494_vm9 = vcmask 57344  }
  0x14   : > { %463 = vst.msk [vmem:[#allocation3 + $0x8] sm:$0xff] %vm462_vm6, %v1299_v6  ;;  %v1249_v62 = vld [vmem:[%s1544_s4 + $0x10] sm:$0xff]  ;;  %v1266_v0 = vld [vmem:[%s1543_s3 + $0x78] sm:$0xff]  ;;  %v1256_v1 = vld [vmem:[%s1543_s3 + $0x28] sm:$0xff]  ;;  %vm484_vm10 = vcmask 1047617   ;;  %vm486_vm11 = vcmask 64513  }
  0x15   : > { %334 = vmatpush.bf16.msra.mxu0 %v1242_v16  ;;  %381 = vmatpush.bf16.msra.mxu1 %v1238_v17  ;;  %465 = vst.msk [vmem:[#allocation3 + $0x18] sm:$0xff] %vm462_vm6, %v1299_v6  ;;  %v1248_v2 = vld [vmem:[%s1544_s4 + $0x8] sm:$0xff]  ;;  %v1274_v3 = vld [vmem:[%s1543_s3 + $0xb8] sm:$0xff]  ;;  %v1255_v4 = vld [vmem:[%s1543_s3 + $0x20] sm:$0xff]  ;;  %vm488_vm12 = vcmask 1047616   ;;  %vm490_vm13 = vcmask 64512  }
  0x16   : > { %441 = vmatpush.bf16.msra.mxu2 %v1246_v18  ;;  %v1247_v5 = vld [vmem:[%s1544_s4] sm:$0xff]  ;;  %v1265_v6 = vld [vmem:[%s1543_s3 + $0x70] sm:$0xff]  ;;  %v1254_v8 = vld [vmem:[%s1543_s3 + $0x18] sm:$0xff]  ;;  %vm829_vm14 = vcmask 1046528   ;;  %vm685_vm15 = vsmask.f32 7424 }
  0x17   : > { %587 = vmatpush.bf16.msra.mxu3 %v1257_v61  ;;  %v1273_v7 = vld [vmem:[%s1543_s3 + $0xb0] sm:$0xff]  ;;  %v1264_v9 = vld [vmem:[%s1543_s3 + $0x68] sm:$0xff]  ;;  %v1263_v14 = vld [vmem:[%s1543_s3 + $0x60] sm:$0xff] }
  0x18   : > { %264 = vrot.lane.b32.xlu0 %v1371_v12, %s1300_s9  ;;  %v1272_v10 = vld [vmem:[%s1543_s3 + $0xa8] sm:$0xff]  ;;  %v1253_v13 = vld [vmem:[%s1543_s3 + $0x10] sm:$0xff]  ;;  %v1271_v16 = vld [vmem:[%s1543_s3 + $0xa0] sm:$0xff] }
  0x19   : > { %335 = vmatpush.bf16.msra.mxu0 %v1241_v19  ;;  %382 = vmatpush.bf16.msra.mxu1 %v1237_v20  ;;  %v1252_v17 = vld [vmem:[%s1543_s3 + $0x8] sm:$0xff]  ;;  %v1262_v11 = vld [vmem:[%s1543_s3 + $0x58] sm:$0xff]  ;;  %v1261_v19 = vld [vmem:[%s1543_s3 + $0x50] sm:$0xff] }
  0x1a   : > { %442 = vmatpush.bf16.msra.mxu2 %v1245_v21  ;;  %v1270_v12 = vld [vmem:[%s1543_s3 + $0x98] sm:$0xff]  ;;  %v1269_v20 = vld [vmem:[%s1543_s3 + $0x90] sm:$0xff] }
  0x1b   : > { %588 = vmatpush.bf16.msra.mxu3 %v1256_v1  ;;  %v1277_v21 = vld [vmem:[%s1543_s3 + $0xd0] sm:$0xff] }
  0x1d   : > { %336 = vmatpush.bf16.msra.mxu0 %v1240_v22  ;;  %383 = vmatpush.bf16.msra.mxu1 %v1236_v23  ;;  %v1259_v22 = vld [vmem:[%s1543_s3 + $0x40] sm:$0xff]  ;;  %v1260_v23 = vld [vmem:[%s1543_s3 + $0x48] sm:$0xff] }
  0x1e   : > { %443 = vmatpush.bf16.msra.mxu2 %v1244_v24 }
  0x1f   : > { %589 = vmatpush.bf16.msra.mxu3 %v1255_v4 }
  0x21   : > { %337 = vmatpush.bf16.msra.mxu0 %v1239_v25  ;;  %384 = vmatpush.bf16.msra.mxu1 %v1235_v26 }
  0x22   : > { %444 = vmatpush.bf16.msra.mxu2 %v1243_v27 }
  0x23   : > { %590 = vmatpush.bf16.msra.mxu3 %v1254_v8 }
  0x25   : > { %646 = vmatpush.bf16.msrb.mxu1 %v1250_v58  ;;  %894 = vmatpush.bf16.msrb.mxu0 %v1276_v59 }
  0x26   : > { %768 = vmatpush.bf16.msrb.mxu2 %v1267_v60 }
  0x27   : > { %591 = vmatpush.bf16.msra.mxu3 %v1253_v13 }
  0x29   : > { %647 = vmatpush.bf16.msrb.mxu1 %v1249_v62  ;;  %895 = vmatpush.bf16.msrb.mxu0 %v1275_v63 }
  0x2a   : > { %769 = vmatpush.bf16.msrb.mxu2 %v1266_v0 }
  0x2b   : > { %592 = vmatpush.bf16.msra.mxu3 %v1252_v17 }
  0x2d   : > { %648 = vmatpush.bf16.msrb.mxu1 %v1248_v2  ;;  %896 = vmatpush.bf16.msrb.mxu0 %v1274_v3 }
  0x2e   : > { %770 = vmatpush.bf16.msrb.mxu2 %v1265_v6 }
  0x31   : > { %649 = vmatpush.bf16.msrb.mxu1 %v1247_v5  ;;  %897 = vmatpush.bf16.msrb.mxu0 %v1273_v7 }
  0x32   : > { %771 = vmatpush.bf16.msrb.mxu2 %v1264_v9 }
  0x35   : > { %898 = vmatpush.bf16.msrb.mxu0 %v1272_v10 }
  0x36   : > { %772 = vmatpush.bf16.msrb.mxu2 %v1263_v14 }
  0x39   : > { %899 = vmatpush.bf16.msrb.mxu0 %v1271_v16 }
  0x3a   : > { %773 = vmatpush.bf16.msrb.mxu2 %v1262_v11 }
  0x3d   : > { %900 = vmatpush.bf16.msrb.mxu0 %v1270_v12 }
  0x3e   : > { %774 = vmatpush.bf16.msrb.mxu2 %v1261_v19 }
  0x41   : > { %901 = vmatpush.bf16.msrb.mxu0 %v1269_v20  ;;  %v1290_v20 = vld [vmem:[%s1545_s5] ss:$0 sm:$0xff] }
  0x42   : > { %775 = vmatpush.bf16.msrb.mxu2 %v1260_v23 }
  0x82   : > { %v263_v28 = vpop.permute.xlu0 %262 }
  0x83   : > { %269 = vst.msk [vmem:[#allocation2 + $0x1] sm:$0xff] %vm268_vm3, %v263_v28 }
  0x8a   : > { %v265_v29 = vpop.permute.xlu0 %264  ;;  %v283_v30 = vld [vmem:[#allocation2 + $0x1] sm:$0xff] }
  0x8b   : > { %270 = vst.msk [vmem:[#allocation2 + $0x9] sm:$0xff] %vm268_vm3, %v265_v29  ;;  %v271_v31 = vld [vmem:[#allocation2] sm:$0xff] }
  0x92   : > { %v284_v32 = vld [vmem:[#allocation2 + $0x9] sm:$0xff] }
  0x93   : > { %v272_v33 = vld [vmem:[#allocation2 + $0x8] sm:$0xff]  ;;  %v285_v35 = vpack.c.bf16 %v284_v32, %v283_v30 }
  0x94   : > { %v391_v34 = vld [vmem:[#allocation2 + $0x2] sm:$0xff]  ;;  %v273_v36 = vpack.c.bf16 %v272_v33, %v271_v31  ;;  %v392_v37 = vld [vmem:[#allocation2 + $0xa] sm:$0xff] }
  0x95   : > { %v393_v38 = vpack.c.bf16 %v392_v37, %v391_v34  ;;  %1023 = vmatmul.msk.bf16.vlgmr.msra.gmra.mxu0 %vm255_vm0, %v285_v35  ;;  %v1268_v32 = vld [vmem:[%s1543_s3 + $0x88] sm:$0xff] }
  0x96   : > { %1040 = vmatmul.msk.bf16.vlgmr.msra.gmra.mxu1 %vm255_vm0, %v273_v36 }
  0x97   : > { %1066 = vmatmul.msk.bf16.vlgmr.msra.gmra.mxu2 %vm255_vm0, %v393_v38  ;;  %915 = vmatpush.bf16.msra.mxu1 %v1277_v21 }
  0xa6   : > { %1120 = vmatmul.msk.bf16.vlgmr.msrb.gmra.mxu1 %vm638_vm7, %v496_v15  ;;  %v1251_v15 = vld [vmem:[%s1543_s3] sm:$0xff] }
  0xa7   : > { %593 = vmatpush.bf16.msra.mxu3 %v1251_v15 }
  0xab   : > { %607 = vmatpush.bf16.msrb.mxu3 %v1259_v22 }
 0x112   : > { %v339_v39 = vpop.f32.mrf.mxu0 }
 0x113   : > { %v386_v40 = vpop.f32.mrf.mxu1 }
 0x114   : > { %v387_v41 = vadd.f32 %v386_v40, %v339_v39 }
 0x11a   : > { %v446_v43 = vpop.f32.mrf.mxu2  ;;  %v341_v46 = vpop.f32.mrf.mxu0 }
 0x11b   : > { %v451_v44 = vadd.f32 %v446_v43, %v387_v41  ;;  %v388_v47 = vpop.f32.mrf.mxu1 }
 0x11c   : > { %v389_v49 = vadd.f32 %v388_v47, %v341_v46 }
 0x11d   : > { %v457_v45 = vadd.f32 %v1289_v42, %v451_v44 }
 0x11f   : > { %v459_v48 = vmax.f32 %v457_v45, 0.0 }
 0x121   : > { %v472_v50 = vrot.slane %v459_v48, 7 }
 0x122   : > { %v448_v51 = vpop.f32.mrf.mxu2 }
 0x123   : > { %v452_v52 = vadd.f32 %v448_v51, %v389_v49  ;;  %475 = vrot.lane.b32.xlu1 %v472_v50, %s1301_s15  ;;  %v651_v7 = vpop.f32.mrf.mxu1 }
 0x125   : > { %v458_v53 = vadd.f32 %v1289_v42, %v452_v52 }
 0x127   : > { %v460_v54 = vmax.f32 %v458_v53, 0.0 }
 0x129   : > { %v473_v55 = vrot.slane %v460_v54, 7 }
 0x12b   : > { %479 = vrot.lane.b32.xlu2 %v473_v55, %s1301_s15  ;;  %v474_v56 = vsel %vm471_vm5, %v472_v50, %v473_v55  ;;  %v653_v9 = vpop.f32.mrf.mxu1 }
 0x12c   : > { %477 = vrot.lane.b32.xlu1 %v474_v56, %s1301_s15 }
 0x185   : > { %v480_v18 = vpop.permute.xlu2 %479 }
 0x186   : > { %493 = vst.msk [vmem:[#allocation3 + $0x20] sm:$0x1] %vm492_vm8, %v480_v18 }
 0x187   : > { %495 = vst.msk [vmem:[#allocation3 + $0x28] sm:$0x1] %vm494_vm9, %v480_v18 }
 0x18d   : > { %v800_v26 = vld [vmem:[#allocation3 + $0x20] sm:$0x3] }
 0x18e   : > { %v660_v27 = vld [vmem:[#allocation3 + $0x20] sm:$0x1]  ;;  %v801_v28 = vld [vmem:[#allocation3 + $0x28] sm:$0x3]  ;;  %v804_v30 = vpack.c.bf16 %v800_v26, %v800_v26 }
 0x18f   : > { %v664_v31 = vpack.c.bf16 %v660_v27, %v660_v27  ;;  %v805_v36 = vpack.c.bf16 %v801_v28, %v801_v28  ;;  %v661_v60 = vld [vmem:[#allocation3 + $0x28] sm:$0x1] }
 0x190   : > { %v831_v44 = vrot.slane %v804_v30, 1  ;;  %v665_v62 = vpack.c.bf16 %v661_v60, %v661_v60 }
 0x191   : > { %v694_v46 = vshll.u32 %v664_v31, 16  ;;  %v834_v48 = vrot.slane %v805_v36, 1 }
 0x192   : > { %v706_v1 = vshll.u32 %v665_v62, 16 }
 0x193   : > { %v696_v54 = vrot.slane %v694_v46, 1 }
 0x194   : > { %v708_v3 = vrot.slane %v706_v1, 1 }
 0x195   : > { %v476_v24 = vpop.permute.xlu1 %475 }
 0x196   : > { %485 = vst.msk [vmem:[#allocation3] sm:$0xfe] %vm484_vm10, %v476_v24 }
 0x197   : > { %487 = vst.msk [vmem:[#allocation3 + $0x8] sm:$0xfe] %vm486_vm11, %v476_v24 }
 0x19d   : > { %v505_v29 = vld [vmem:[#allocation3] sm:$0xff] }
 0x19e   : > { %v478_v25 = vpop.permute.xlu1 %477  ;;  %v656_v34 = vld [vmem:[#allocation3] sm:$0xfe]  ;;  %v799_v41 = vld [vmem:[#allocation3 + $0x8] sm:$0xfc] }
 0x19f   : > { %489 = vst.msk [vmem:[#allocation3 + $0x10] sm:$0xff] %vm488_vm12, %v478_v25  ;;  %v798_v35 = vld [vmem:[#allocation3] sm:$0xfc]  ;;  %v506_v56 = vld [vmem:[#allocation3 + $0x8] sm:$0xff] }
 0x1a0   : > { %491 = vst.msk [vmem:[#allocation3 + $0x18] sm:$0xff] %vm490_vm13, %v478_v25  ;;  %v657_v57 = vld [vmem:[#allocation3 + $0x8] sm:$0xfe] }
 0x1a6   : > { %v507_v33 = vld [vmem:[#allocation3 + $0x10] sm:$0xff] }
 0x1a7   : > { %v509_v37 = vpack.c.bf16 %v507_v33, %v505_v29  ;;  %v662_v38 = vpack.c.bf16 %v507_v33, %v656_v34  ;;  %v802_v39 = vpack.c.bf16 %v507_v33, %v798_v35  ;;  %v659_v40 = vld [vmem:[#allocation3 + $0x18] sm:$0xff] }
 0x1a8   : > { %v803_v42 = vpack.c.bf16 %v659_v40, %v799_v41  ;;  %v510_v58 = vpack.c.bf16 %v659_v40, %v506_v56  ;;  %v663_v59 = vpack.c.bf16 %v659_v40, %v657_v57 }
 0x1a9   : > { %594 = vmatmul.bf16.vlgmr.msra.gmra.mxu3 %v509_v37  ;;  %v830_v43 = vrot.slane %v802_v39, 1  ;;  %v689_v45 = vshll.u32 %v662_v38, 16  ;;  %v687_v50 = vshrl.u32 %v662_v38, 16 }
 0x1aa   : > { %v833_v47 = vrot.slane %v803_v42, 1  ;;  %789 = vmatpush.bf16.msra.mxu3 %v1268_v32  ;;  %v701_v61 = vshll.u32 %v663_v59, 16  ;;  %v699_v0 = vshrl.u32 %v663_v59, 16 }
 0x1ab   : > { %v832_v49 = vsel %vm829_vm14, %v830_v43, %v831_v44  ;;  %v691_v51 = vrot.slane %v689_v45, 1 }
 0x1ac   : > { %902 = vmatmul.bf16.vlgmr.msrb.gmra.mxu0 %v832_v49  ;;  %v835_v52 = vsel %vm829_vm14, %v833_v47, %v834_v48  ;;  %v703_v63 = vrot.slane %v701_v61, 1 }
 0x1ad   : > { %1230 = vmatmul.msk.bf16.vlgmr.msra.gmra.mxu1 %vm462_vm6, %v835_v52  ;;  %v692_v53 = vor.u32 %v691_v51, %v687_v50 }
 0x1ae   : > { %v704_v2 = vor.u32 %v703_v63, %v699_v0 }
 0x1af   : > { %v697_v55 = vsel %vm685_vm15, %v692_v53, %v696_v54 }
 0x1b0   : > { %776 = vmatmul.bf16.vlgmr.msrb.gmra.mxu2 %v697_v55  ;;  %v709_v4 = vsel %vm685_vm15, %v704_v2, %v708_v3 }
 0x1b9   : > { %1103 = vmatmul.msk.bf16.vlgmr.msrb.gmra.mxu3 %vm462_vm6, %v510_v58 }
 0x1c9   : > { %1175 = vmatmul.msk.bf16.vlgmr.msra.gmra.mxu3 %vm462_vm6, %v709_v4 }
 0x229   : > { %v903_v13 = vpop.f32.mrf.mxu0 }
 0x22a   : > { %v917_v14 = vpop.f32.mrf.mxu1 }
 0x22b   : > { %v918_v18 = vadd.f32 %v917_v14, %v903_v13 }
 0x22c   : > { %v595_v5 = vpop.f32.mrf.mxu3 }
 0x231   : > { %v905_v23 = vpop.f32.mrf.mxu0 }
 0x232   : > { %v919_v24 = vpop.f32.mrf.mxu1 }
 0x233   : > { %v777_v17 = vpop.f32.mrf.mxu2  ;;  %v920_v31 = vadd.f32 %v919_v24, %v905_v23 }
 0x234   : > { %v597_v6 = vpop.f32.mrf.mxu3 }
 0x23b   : > { %v779_v26 = vpop.f32.mrf.mxu2 }
 0x23c   : > { %v609_v8 = vpop.f32.mrf.mxu3 }
 0x23d   : > { %v610_v16 = vadd.f32 %v609_v8, %v595_v5 }
 0x23f   : > { %v652_v12 = vadd.f32 %v651_v7, %v610_v16 }
 0x244   : > { %v611_v10 = vpop.f32.mrf.mxu3 }
 0x245   : > { %v612_v21 = vadd.f32 %v611_v10, %v597_v6 }
 0x247   : > { %v654_v28 = vadd.f32 %v653_v9, %v612_v21 }
 0x24c   : > { %v791_v11 = vpop.f32.mrf.mxu3 }
 0x24d   : > { %v792_v15 = vadd.f32 %v791_v11, %v777_v17 }
 0x24f   : > { %v796_v19 = vadd.f32 %v792_v15, %v652_v12 }
 0x251   : > { %v922_v22 = vadd.f32 %v918_v18, %v796_v19 }
 0x253   : > { %v928_v25 = vadd.f32 %v1290_v20, %v922_v22 }
 0x254   : > { %v793_v27 = vpop.f32.mrf.mxu3 }
 0x255   : > { %v930_v29 = vmax.f32 %v928_v25, 0.0  ;;  %v794_v30 = vadd.f32 %v793_v27, %v779_v26 }
 0x257   : > { %932 = vst [vmem:[%s251_s19] sm:$0xff] %v930_v29  ;;  %v797_v32 = vadd.f32 %v794_v30, %v654_v28 }
 0x259   : > { %v923_v33 = vadd.f32 %v920_v31, %v797_v32 }
 0x25b   : > { %v929_v34 = vadd.f32 %v1290_v20, %v923_v33 }
 0x25d   : > { %v931_v35 = vmax.f32 %v929_v34, 0.0 }
 0x25f   : > { %933 = vst [vmem:[%s251_s19 + $0x8] sm:$0xff] %v931_v35 }
 0x260 PF: > { %s16_s21 = sadd.s32 1, %s1297_s21  }
 0x261   : > { %p13_p4 = scmp.ge.s32.totalorder %s16_s21, 4  }
 0x263   :  { %15 = sbr.rel (!%p13_p4) target bundleno = 1 (0x1), region = 78 }

</bundles_post_ra>
